<compile_context>
chip_gen: v5e
topology: v5e:2x2
jax: 0.10.0
libtpu: 0.0.40
codegen_flags: <defaults>
</compile_context>

<pallas_src>
import functools

import jax
import jax.numpy as jnp
import numpy as np
from jax.experimental import pallas as pl
from jax.experimental.pallas import tpu as pltpu


def _curves_kernel(p_ref, b_ref, noise_ref, curve_ref, curve_m_ref, *,
                   noise_scale):
    """Fused curve evaluation in lane-dense layout.

    p_ref:     (3*n_curves, K)            control points, row = n*3 + coord
    b_ref:     (K, num_t)                 (matrix_t @ matrix_w)^T, t on lanes
    noise_ref: (multiply, 3*n_curves, num_t)
    curve_ref: (3*n_curves, num_t)
    curve_m_ref: (multiply, 3*n_curves, num_t)
    """
    # Single fused matmul replacing the 12 per-curve (num_t,K)@(K,3) matmuls.
    pts = jnp.dot(p_ref[...], b_ref[...],
                  preferred_element_type=jnp.float32)       # (3*n_curves, num_t)

    # One full-slab store per output; pts stays live (no VMEM round trip).
    curve_ref[...] = pts
    curve_m_ref[...] = pts[None, :, :] + noise_scale * noise_ref[...]


def curves_forward(matrix_t, matrix_w, params, noise, var_coef=1.0,
                   multiply=5, variance=0.5):
    """Returns (pts_curve, pts_curve_m, params) like Curves_Model.forward.

    noise: (multiply * n_curves * num_t, 3) standard-normal samples (the torch
    RNG stream is not reproduced; noise is supplied explicitly).
    """
    num_t, k = matrix_t.shape
    n_curves = params.shape[0]
    n_pts = n_curves * num_t
    r_dim = 3 * n_curves
    noise_scale = float(variance ** 0.5) * float(var_coef)

    # Basis is fixed per curve_type: fold matrix_t @ matrix_w outside the
    # kernel, transposed so the long t axis lands on lanes.
    basis_t = jnp.dot(matrix_t, matrix_w).T                     # (K, num_t)
    # params (n_curves, K, 3) -> (3*n_curves, K), row index = n*3 + coord.
    params_rk = jnp.transpose(params, (0, 2, 1)).reshape(r_dim, k)
    # noise (multiply*n_pts, 3) -> lane-dense (multiply, 3*n_curves, num_t).
    noise_t = jnp.transpose(
        noise.reshape(multiply, n_curves, num_t, 3), (0, 1, 3, 2)
    ).reshape(multiply, r_dim, num_t)

    flops = 2 * r_dim * k * num_t + 2 * multiply * r_dim * num_t
    bytes_accessed = 4 * (r_dim * k + k * num_t
                          + 2 * multiply * r_dim * num_t + r_dim * num_t)

    kernel = functools.partial(_curves_kernel, noise_scale=noise_scale)

    curve_cn, curve_m_cn = pl.pallas_call(
        kernel,
        grid=(1,),
        in_specs=[
            pl.BlockSpec((r_dim, k), lambda i: (0, 0)),
            pl.BlockSpec((k, num_t), lambda i: (0, 0)),
            pl.BlockSpec((multiply, r_dim, num_t), lambda i: (0, 0, 0)),
        ],
        out_specs=[
            pl.BlockSpec((r_dim, num_t), lambda i: (0, 0)),
            pl.BlockSpec((multiply, r_dim, num_t), lambda i: (0, 0, 0)),
        ],
        out_shape=(
            jax.ShapeDtypeStruct((r_dim, num_t), jnp.float32),
            jax.ShapeDtypeStruct((multiply, r_dim, num_t), jnp.float32),
        ),
        compiler_params=pltpu.CompilerParams(
            dimension_semantics=("arbitrary",)),
        cost_estimate=pl.CostEstimate(flops=int(flops), transcendentals=0,
                                      bytes_accessed=int(bytes_accessed)),
    )(params_rk, basis_t, noise_t)

    # Back to the PyTorch (1, N, 3) convention in the wrapper.
    pts_curve = jnp.transpose(
        curve_cn.reshape(n_curves, 3, num_t), (0, 2, 1)
    ).reshape(1, n_pts, 3)
    pts_curve_m = jnp.transpose(
        curve_m_cn.reshape(multiply, n_curves, 3, num_t), (0, 1, 3, 2)
    ).reshape(1, multiply * n_pts, 3)
    return pts_curve, pts_curve_m, params


def make_cubic_bezier_basis(num=100):
    """matrix_w and matrix_t for curve_type='cubic' (as in __init__)."""
    matrix_w = jnp.array([[-1, 3, -3, 1],
                          [3, -6, 3, 0],
                          [-3, 3, 0, 0],
                          [1, 0, 0, 0]], dtype=jnp.float32)
    t = np.linspace(0.0, 1.0, num)
    matrix_t = jnp.asarray(
        np.stack([t * t * t, t * t, t, np.ones_like(t)], axis=1),
        dtype=jnp.float32)
    return matrix_t, matrix_w


if __name__ == "__main__":
    n_curves = 12
    n_ctl_points = 4          # cubic
    num_t = 100               # get_matrix_t(num=100)
    multiply = 5
    variance = 0.5
    var_coef = 1.0

    matrix_t, matrix_w = make_cubic_bezier_basis(num=num_t)

    key = jax.random.PRNGKey(0)
    k_params, k_noise = jax.random.split(key)
    # torch.rand(n_curves, 4, 3) equivalent (deterministic, uniform [0,1)).
    params = jax.random.uniform(k_params, (n_curves, n_ctl_points, 3),
                                dtype=jnp.float32)
    # torch.randn_like(pts_curve_m) equivalent, generated outside the kernel.
    # TODO(synk): could be generated on-chip via pltpu.prng_seed +
    # pltpu.stateful_normal; kept as an input so the result is exactly
    # verifiable against a pure-JAX reference.
    n_pts = n_curves * num_t
    noise = jax.random.normal(k_noise, (n_pts * multiply, 3),
                              dtype=jnp.float32)

    pts_curve, pts_curve_m, out_params = curves_forward(
        matrix_t, matrix_w, params, noise,
        var_coef=var_coef, multiply=multiply, variance=variance)
    jax.block_until_ready((pts_curve, pts_curve_m, out_params))

    # Pure-JAX reference for validation.
    m1_ref = matrix_t @ matrix_w
    m2_ref = jnp.einsum('ik,nkj->nij', m1_ref, params)
    ref_curve = m2_ref.reshape(1, -1, 3)
    ref_curve_m = (jnp.tile(ref_curve, (1, multiply, 1))
                   + (variance ** 0.5) * var_coef * noise.reshape(1, -1, 3))

    assert pts_curve.shape == (1, n_pts, 3)
    assert pts_curve_m.shape == (1, n_pts * multiply, 3)
    assert out_params.shape == (n_curves, n_ctl_points, 3)
    np.testing.assert_allclose(np.asarray(pts_curve), np.asarray(ref_curve),
                               rtol=1e-5, atol=1e-5)
    np.testing.assert_allclose(np.asarray(pts_curve_m), np.asarray(ref_curve_m),
                               rtol=1e-5, atol=1e-5)

    print("KERNEL_OK")
</pallas_src>

<mosaic_0001>
module attributes {stable_mosaic.version = 11 : i64} {
  func.func @_curves_kernel(%arg0: i32, %arg1: memref<36x4xf32, #tpu.memory_space<vmem>>, %arg2: memref<4x100xf32, #tpu.memory_space<vmem>>, %arg3: memref<5x36x100xf32, #tpu.memory_space<vmem>>, %arg4: memref<36x100xf32, #tpu.memory_space<vmem>>, %arg5: memref<5x36x100xf32, #tpu.memory_space<vmem>>) attributes {dimension_semantics = [#tpu.dimension_semantics<arbitrary>], iteration_bounds = array<i64: 1>, scalar_prefetch = 0 : i64, scratch_operands = 0 : i64, tpu.core_type = #tpu.core_type<tc>, window_params = [{pipeline_mode = #tpu.pipeline_mode<synchronous>, transform_indices = @transform_0, window_bounds = array<i64: 36, 4>}, {pipeline_mode = #tpu.pipeline_mode<synchronous>, transform_indices = @transform_1, window_bounds = array<i64: 4, 100>}, {pipeline_mode = #tpu.pipeline_mode<synchronous>, transform_indices = @transform_2, window_bounds = array<i64: 5, 36, 100>}, {pipeline_mode = #tpu.pipeline_mode<synchronous>, transform_indices = @transform_3, window_bounds = array<i64: 36, 100>}, {pipeline_mode = #tpu.pipeline_mode<synchronous>, transform_indices = @transform_4, window_bounds = array<i64: 5, 36, 100>}]} {
    %c0 = arith.constant 0 : index
    %c0_0 = arith.constant 0 : index
    %0 = vector.load %arg1[%c0, %c0_0] : memref<36x4xf32, #tpu.memory_space<vmem>>, vector<36x4xf32>
    %c0_1 = arith.constant 0 : index
    %c0_2 = arith.constant 0 : index
    %1 = vector.load %arg2[%c0_1, %c0_2] : memref<4x100xf32, #tpu.memory_space<vmem>>, vector<4x100xf32>
    %cst = arith.constant dense<0.000000e+00> : vector<36x100xf32>
    %2 = tpu.matmul %0, %1, %cst {dimension_numbers = #tpu.dot_dimension_numbers<[1], [0], [0], [1], [0, 0, 1, 1], [], []>} : vector<36x4xf32>, vector<4x100xf32>, vector<36x100xf32> -> vector<36x100xf32>
    %c0_3 = arith.constant 0 : index
    %c0_4 = arith.constant 0 : index
    %3 = vector.load %arg4[%c0_3, %c0_4] : memref<36x100xf32, #tpu.memory_space<vmem>>, vector<36x100xf32>
    tpu.vector_store %arg4[%c0_3, %c0_4], %2 {strides = array<i32>} : memref<36x100xf32, #tpu.memory_space<vmem>>, vector<36x100xf32>,
    %4 = vector.shape_cast %2 : vector<36x100xf32> to vector<1x36x100xf32>
    %c0_5 = arith.constant 0 : index
    %c0_6 = arith.constant 0 : index
    %c0_7 = arith.constant 0 : index
    %5 = vector.load %arg3[%c0_5, %c0_6, %c0_7] : memref<5x36x100xf32, #tpu.memory_space<vmem>>, vector<5x36x100xf32>
    %cst_8 = arith.constant 0.707106769 : f32
    %6 = vector.broadcast %cst_8 : f32 to vector<5x36x100xf32>
    %7 = arith.mulf %6, %5 : vector<5x36x100xf32>
    %8 = vector.broadcast %4 : vector<1x36x100xf32> to vector<5x36x100xf32>
    %9 = arith.addf %8, %7 : vector<5x36x100xf32>
    %c0_9 = arith.constant 0 : index
    %c0_10 = arith.constant 0 : index
    %c0_11 = arith.constant 0 : index
    %10 = vector.load %arg5[%c0_9, %c0_10, %c0_11] : memref<5x36x100xf32, #tpu.memory_space<vmem>>, vector<5x36x100xf32>
    tpu.vector_store %arg5[%c0_9, %c0_10, %c0_11], %9 {strides = array<i32>} : memref<5x36x100xf32, #tpu.memory_space<vmem>>, vector<5x36x100xf32>,
    return
  }
  func.func @transform_0(%arg0: i32) -> (i32, i32) {
    %c0_i32 = arith.constant 0 : i32
    %c0_i32_0 = arith.constant 0 : i32
    %c0_i32_1 = arith.constant 0 : i32
    return %c0_i32, %c0_i32_0 : i32, i32
  }
  func.func @transform_1(%arg0: i32) -> (i32, i32) {
    %c0_i32 = arith.constant 0 : i32
    %c0_i32_0 = arith.constant 0 : i32
    %c0_i32_1 = arith.constant 0 : i32
    return %c0_i32, %c0_i32_0 : i32, i32
  }
  func.func @transform_2(%arg0: i32) -> (i32, i32, i32) {
    %c0_i32 = arith.constant 0 : i32
    %c0_i32_0 = arith.constant 0 : i32
    %c0_i32_1 = arith.constant 0 : i32
    %c0_i32_2 = arith.constant 0 : i32
    return %c0_i32, %c0_i32_0, %c0_i32_1 : i32, i32, i32
  }
  func.func @transform_3(%arg0: i32) -> (i32, i32) {
    %c0_i32 = arith.constant 0 : i32
    %c0_i32_0 = arith.constant 0 : i32
    %c0_i32_1 = arith.constant 0 : i32
    return %c0_i32, %c0_i32_0 : i32, i32
  }
  func.func @transform_4(%arg0: i32) -> (i32, i32, i32) {
    %c0_i32 = arith.constant 0 : i32
    %c0_i32_0 = arith.constant 0 : i32
    %c0_i32_1 = arith.constant 0 : i32
    %c0_i32_2 = arith.constant 0 : i32
    return %c0_i32, %c0_i32_0, %c0_i32_1 : i32, i32, i32
  }
}

</mosaic_0001>

<bundles_post_ra>
// kernel: tpu_custom_call.1
= control target key start
LH: loop header
LB: loop body
LE: loop exit
PB: predicated region body
PF: predicated region fallthrough
CT: control target
= control target key end

     0   :  { %10 = vsyncpa [#allocation3], 0  ;;  %s424_s0 = inlined_call_operand.vmem [shape: f32[36,4], index: 0, kind: input, shape index: {}]   ;;  %s425_s1 = inlined_call_operand.vmem [shape: f32[4,100], index: 1, kind: input, shape index: {}]   ;;  %s426_s2 = inlined_call_operand.hbm [shape: f32[5,36,100], index: 2, kind: input, shape index: {}]   ;;  %s427_s3 = inlined_call_operand.hbm [shape: f32[36,100], index: 3, kind: output, shape index: {0}]   ;;  %s428_s4 = inlined_call_operand.hbm [shape: f32[5,36,100], index: 4, kind: output, shape index: {1}]  }
   0x1   :  { %11 = vsyncpa [#allocation4], 0 }
   0x2   :  { %12 = vsyncpa [#allocation7], 0  ;;  %s21_s17 = sshll.u32 %s426_s2, 4  ;;  %s328_s18 = smov [#allocation2]   ;;  %s22_s17 = int_to_ptr.hbm [resolvable:$true] %s21_s17 }
   0x3   :  { %s23_s19 = sshll.u32 %s328_s18, 4  ;;  %s329_s20 = smov 128   ;;  %s24_s19 = int_to_ptr.vmem [resolvable:$true] %s23_s19 }
   0x4   :  { %s330_s21 = smov 8  }
   0x5   :  { %29 = dma.hbm_to_vmem [thread:$0]  %s22_s17, 3200, %s24_s19, [#allocation3], %s329_s20, %s329_s20, %s330_s21  }
   0x6   :  { %322 = dma.done.wait [#allocation3], 3200  }
   0x7   :  { %323 = vsyncadd [#allocation3], 4294964096  ;;  %vm56_vm0 = vcmask 1043456   ;;  %vm40_vm1 = vcmask 31744   ;;  %v39_v0 = vld [vmem:[%s425_s1] sm:$0xf] }
   0x8   :  { %v36_v1 = vld [vmem:[%s424_s0 + $0x10] sm:$0xff]  ;;  %243 = vmatpush.msk.msra.mxu2 %vm56_vm0, %v39_v0  ;;  %244 = vmatpush.msk.msra.mxu3 %vm56_vm0, %v39_v0  ;;  %v38_v2 = vld [vmem:[%s424_s0 + $0x20] sm:$0xf]  ;;  %v35_v4 = vld [vmem:[%s424_s0 + $0x8] sm:$0xff]  ;;  %vm92_vm2 = vcmask 818176   ;;  %s205_s9 = sshll.u32 %s427_s3, 4  ;;  %s206_s9 = int_to_ptr.hbm [resolvable:$true] %s205_s9 }
   0x9   :  { %v34_v3 = vld [vmem:[%s424_s0] sm:$0xff]  ;;  %239 = vmatmul.msk.f32.vlgmr.msra.gmra.mxu2 %vm40_vm1, %v36_v1  ;;  %241 = vmatmul.msk.f32.vlgmr.msra.gmra.mxu3 %vm40_vm1, %v38_v2  ;;  %v37_v5 = vld [vmem:[%s424_s0 + $0x18] sm:$0xff]  ;;  %v104_v7 = vld [vmem:[#allocation2 + $0x28] sm:$0xff]  ;;  %s331_s0 = smov [#allocation5]   ;;  %vm97_vm3 = vcmask 814080   ;;  %s332_s3 = smov [#allocation6]  }
   0xa   :  { %236 = vmatpush.msk.msra.mxu0 %vm56_vm0, %v39_v0  ;;  %242 = vmatpush.msk.msra.mxu1 %vm56_vm0, %v39_v0  ;;  %v99_v6 = vld [vmem:[#allocation2] sm:$0xff]  ;;  %v109_v8 = vld [vmem:[#allocation2 + $0x50] sm:$0xff]  ;;  %v129_v11 = vmul.f32 0.70710677, %v104_v7  ;;  %v106_v12 = vld [vmem:[#allocation2 + $0x38] sm:$0xff]  ;;  %s203_s6 = sshll.u32 %s331_s0, 4  ;;  %s204_s6 = int_to_ptr.vmem [resolvable:$true] %s203_s6 }
   0xb   :  { %237 = vmatmul.msk.f32.vlgmr.msra.gmra.mxu0 %vm40_vm1, %v34_v3  ;;  %238 = vmatmul.msk.f32.vlgmr.msra.gmra.mxu1 %vm40_vm1, %v35_v4  ;;  %v101_v9 = vld [vmem:[#allocation2 + $0x10] sm:$0xff]  ;;  %v124_v10 = vmul.f32 0.70710677, %v99_v6  ;;  %v111_v13 = vld [vmem:[#allocation2 + $0x60] sm:$0xff]  ;;  %v134_v14 = vmul.f32 0.70710677, %v109_v8 }
   0xc   :  { %v116_v15 = vld [vmem:[#allocation2 + $0x88] sm:$0xff]  ;;  %v121_v16 = vld [vmem:[#allocation2 + $0xb0] sm:$0xff]  ;;  %v126_v17 = vmul.f32 0.70710677, %v101_v9  ;;  %v131_v20 = vmul.f32 0.70710677, %v106_v12 }
   0xd   :  { %v136_v21 = vmul.f32 0.70710677, %v111_v13  ;;  %v114_v22 = vld [vmem:[#allocation2 + $0x78] sm:$0xff]  ;;  %v141_v25 = vmul.f32 0.70710677, %v116_v15  ;;  %v119_v26 = vld [vmem:[#allocation2 + $0xa0] sm:$0xff] }
   0xe   :  { %v146_v28 = vmul.f32 0.70710677, %v121_v16  ;;  %v100_v29 = vld [vmem:[#allocation2 + $0x8] sm:$0xff]  ;;  %v139_v31 = vmul.f32 0.70710677, %v114_v22  ;;  %v105_v32 = vld [vmem:[#allocation2 + $0x30] sm:$0xff] }
   0xf   :  { %v144_v36 = vmul.f32 0.70710677, %v119_v26  ;;  %v110_v37 = vld [vmem:[#allocation2 + $0x58] sm:$0xff]  ;;  %v115_v39 = vld [vmem:[#allocation2 + $0x80] sm:$0xff]  ;;  %v125_v40 = vmul.f32 0.70710677, %v100_v29 }
  0x10   :  { %v120_v42 = vld [vmem:[#allocation2 + $0xa8] sm:$0xff]  ;;  %v130_v43 = vmul.f32 0.70710677, %v105_v32  ;;  %v135_v45 = vmul.f32 0.70710677, %v110_v37  ;;  %v102_v48 = vld [vmem:[#allocation2 + $0x18] sm:$0xff] }
  0x11   :  { %240 = vmatmul.msk.f32.gmra.mxu2 %vm40_vm1, %v37_v5  ;;  %v140_v47 = vmul.f32 0.70710677, %v115_v39  ;;  %v145_v49 = vmul.f32 0.70710677, %v120_v42  ;;  %v107_v51 = vld [vmem:[#allocation2 + $0x40] sm:$0xff]  ;;  %v112_v53 = vld [vmem:[#allocation2 + $0x68] sm:$0xff] }
  0x12   :  { %v117_v55 = vld [vmem:[#allocation2 + $0x90] sm:$0xff]  ;;  %v127_v56 = vmul.f32 0.70710677, %v102_v48  ;;  %v122_v59 = vld [vmem:[#allocation2 + $0xb8] sm:$0xff]  ;;  %v132_v60 = vmul.f32 0.70710677, %v107_v51 }
  0x13   :  { %v137_v62 = vmul.f32 0.70710677, %v112_v53  ;;  %v142_v63 = vmul.f32 0.70710677, %v117_v55  ;;  %v103_v0 = vld [vmem:[#allocation2 + $0x20] sm:$0xf] }
  0x14   :  { %v147_v1 = vmul.f32 0.70710677, %v122_v59  ;;  %v108_v3 = vld [vmem:[#allocation2 + $0x48] sm:$0xf]  ;;  %v113_v5 = vld [vmem:[#allocation2 + $0x70] sm:$0xf] }
  0x15   :  { %v118_v7 = vld [vmem:[#allocation2 + $0x98] sm:$0xf]  ;;  %v128_v8 = vmul.f32 0.70710677, %v103_v0  ;;  %v133_v12 = vmul.f32 0.70710677, %v108_v3 }
  0x16   :  { %v143_v15 = vmul.f32 0.70710677, %v118_v7  ;;  %s216_s10 = sshll.u32 %s332_s3, 4  ;;  %s218_s13 = sshll.u32 %s428_s4, 4  ;;  %s217_s10 = int_to_ptr.vmem [resolvable:$true] %s216_s10  ;;  %s219_s13 = int_to_ptr.hbm [resolvable:$true] %s218_s13 }
  0x88   :  { %v77_v18 = vpop.f32.mrf.mxu0  ;;  %v80_v19 = vpop.f32.mrf.mxu1 }
  0x89   :  { %93 = vst.msk [vmem:[#allocation5] sm:$0xff] %vm92_vm2, %v77_v18  ;;  %v149_v23 = vadd.f32 %v124_v10, %v77_v18  ;;  %v154_v24 = vadd.f32 %v129_v11, %v77_v18  ;;  %v159_v27 = vadd.f32 %v134_v14, %v77_v18  ;;  %v164_v44 = vadd.f32 %v139_v31, %v77_v18  ;;  %v123_v11 = vld [vmem:[#allocation2 + $0xc0] sm:$0xf] }
  0x8a   :  { %94 = vst.msk [vmem:[#allocation5 + $0x8] sm:$0xff] %vm92_vm2, %v80_v19  ;;  %v169_v46 = vadd.f32 %v144_v36, %v77_v18  ;;  %v150_v50 = vadd.f32 %v125_v40, %v80_v19  ;;  %v155_v52 = vadd.f32 %v130_v43, %v80_v19  ;;  %v160_v54 = vadd.f32 %v135_v45, %v80_v19 }
  0x8b   :  { %174 = vst.msk [vmem:[#allocation6] sm:$0xff] %vm92_vm2, %v149_v23  ;;  %v165_v57 = vadd.f32 %v140_v47, %v80_v19  ;;  %v170_v61 = vadd.f32 %v145_v49, %v80_v19  ;;  %v138_v14 = vmul.f32 0.70710677, %v113_v5  ;;  %v148_v16 = vmul.f32 0.70710677, %v123_v11 }
  0x8c   :  { %v83_v30 = vpop.f32.mrf.mxu2  ;;  %179 = vst.msk [vmem:[#allocation6 + $0x28] sm:$0xff] %vm92_vm2, %v154_v24  ;;  %v89_v10 = vpop.f32.mrf.mxu3 }
  0x8d   :  { %95 = vst.msk [vmem:[#allocation5 + $0x10] sm:$0xff] %vm92_vm2, %v83_v30  ;;  %v151_v33 = vadd.f32 %v126_v17, %v83_v30  ;;  %v156_v34 = vadd.f32 %v131_v20, %v83_v30  ;;  %v161_v35 = vadd.f32 %v136_v21, %v83_v30  ;;  %v166_v38 = vadd.f32 %v141_v25, %v83_v30 }
  0x8e   :  { %184 = vst.msk [vmem:[#allocation6 + $0x50] sm:$0xff] %vm92_vm2, %v159_v27  ;;  %v171_v41 = vadd.f32 %v146_v28, %v83_v30  ;;  %v153_v17 = vadd.f32 %v128_v8, %v89_v10  ;;  %v158_v18 = vadd.f32 %v133_v12, %v89_v10  ;;  %v163_v19 = vadd.f32 %v138_v14, %v89_v10 }
  0x8f   :  { %176 = vst.msk [vmem:[#allocation6 + $0x10] sm:$0xff] %vm92_vm2, %v151_v33  ;;  %v168_v20 = vadd.f32 %v143_v15, %v89_v10  ;;  %v173_v21 = vadd.f32 %v148_v16, %v89_v10 }
  0x90   :  { %181 = vst.msk [vmem:[#allocation6 + $0x38] sm:$0xff] %vm92_vm2, %v156_v34 }
  0x91   :  { %186 = vst.msk [vmem:[#allocation6 + $0x60] sm:$0xff] %vm92_vm2, %v161_v35 }
  0x92   :  { %191 = vst.msk [vmem:[#allocation6 + $0x88] sm:$0xff] %vm92_vm2, %v166_v38 }
  0x93   :  { %196 = vst.msk [vmem:[#allocation6 + $0xb0] sm:$0xff] %vm92_vm2, %v171_v41 }
  0x94   :  { %189 = vst.msk [vmem:[#allocation6 + $0x78] sm:$0xff] %vm92_vm2, %v164_v44  ;;  %v86_v58 = vpop.f32.mrf.mxu2 }
  0x95   :  { %194 = vst.msk [vmem:[#allocation6 + $0xa0] sm:$0xff] %vm92_vm2, %v169_v46  ;;  %v152_v2 = vadd.f32 %v127_v56, %v86_v58  ;;  %v157_v4 = vadd.f32 %v132_v60, %v86_v58  ;;  %v162_v6 = vadd.f32 %v137_v62, %v86_v58  ;;  %v167_v9 = vadd.f32 %v142_v63, %v86_v58 }
  0x96   :  { %175 = vst.msk [vmem:[#allocation6 + $0x8] sm:$0xff] %vm92_vm2, %v150_v50  ;;  %v172_v13 = vadd.f32 %v147_v1, %v86_v58 }
  0x97   :  { %180 = vst.msk [vmem:[#allocation6 + $0x30] sm:$0xff] %vm92_vm2, %v155_v52 }
  0x98   :  { %185 = vst.msk [vmem:[#allocation6 + $0x58] sm:$0xff] %vm92_vm2, %v160_v54 }
  0x99   :  { %190 = vst.msk [vmem:[#allocation6 + $0x80] sm:$0xff] %vm92_vm2, %v165_v57 }
  0x9a   :  { %195 = vst.msk [vmem:[#allocation6 + $0xa8] sm:$0xff] %vm92_vm2, %v170_v61 }
  0x9b   :  { %96 = vst.msk [vmem:[#allocation5 + $0x18] sm:$0xff] %vm92_vm2, %v86_v58 }
  0x9c   :  { %177 = vst.msk [vmem:[#allocation6 + $0x18] sm:$0xff] %vm92_vm2, %v152_v2 }
  0x9d   :  { %182 = vst.msk [vmem:[#allocation6 + $0x40] sm:$0xff] %vm92_vm2, %v157_v4 }
  0x9e   :  { %187 = vst.msk [vmem:[#allocation6 + $0x68] sm:$0xff] %vm92_vm2, %v162_v6 }
  0x9f   :  { %192 = vst.msk [vmem:[#allocation6 + $0x90] sm:$0xff] %vm92_vm2, %v167_v9 }
  0xa0   :  { %197 = vst.msk [vmem:[#allocation6 + $0xb8] sm:$0xff] %vm92_vm2, %v172_v13 }
  0xa1   :  { %98 = vst.msk [vmem:[#allocation5 + $0x20] sm:$0xf] %vm97_vm3, %v89_v10 }
  0xa2   :  { %178 = vst.msk [vmem:[#allocation6 + $0x20] sm:$0xf] %vm97_vm3, %v153_v17  ;;  %211 = dma.vmem_to_hbm [thread:$0]  %s204_s6, 640, %s206_s9, [#allocation4], %s329_s20, %s329_s20, %s330_s21  }
  0xa3   :  { %183 = vst.msk [vmem:[#allocation6 + $0x48] sm:$0xf] %vm97_vm3, %v158_v18 }
  0xa4   :  { %188 = vst.msk [vmem:[#allocation6 + $0x70] sm:$0xf] %vm97_vm3, %v163_v19 }
  0xa5   :  { %193 = vst.msk [vmem:[#allocation6 + $0x98] sm:$0xf] %vm97_vm3, %v168_v20 }
  0xa6   :  { %198 = vst.msk [vmem:[#allocation6 + $0xc0] sm:$0xf] %vm97_vm3, %v173_v21 }
  0xa7   :  { %224 = dma.vmem_to_hbm [thread:$0]  %s217_s10, 3200, %s219_s13, [#allocation7], %s329_s20, %s329_s20, %s330_s21  }
  0xa8   :  { %324 = dma.done.wait [#allocation4], 640  }
  0xa9   :  { %325 = vsyncadd [#allocation4], 4294966656 }
  0xaa   :  { %326 = dma.done.wait [#allocation7], 3200  }
  0xab   :  { %327 = vsyncadd [#allocation7], 4294964096 }
  0xac   :  { %233 = vsyncpa [#allocation3], 1 }
  0xad   :  { %234 = vsyncpa [#allocation4], 1 }
  0xae   :  { %235 = vsyncpa [#allocation7], 1 }

</bundles_post_ra>
